<compile_context>
chip_gen: v5e
topology: v5e:2x2
jax: 0.10.0
libtpu: 0.0.40
codegen_flags: <defaults>
</compile_context>

<pallas_src>
import functools

import jax
import jax.numpy as jnp
import numpy as np
from jax.experimental import pallas as pl
from jax.experimental.pallas import tpu as pltpu


# ----------------------------------------------------------------------------
# Generation-aware VMEM budgeting.
# ----------------------------------------------------------------------------
def _tpu_vmem_capacity_bytes():
    """Per-TensorCore VMEM capacity; conservative 64 MiB fallback (v7x)."""
    try:
        info = pltpu.get_tpu_info()
        for attr in ("vmem_capacity_bytes", "vmem_size_bytes", "vmem_bytes"):
            v = getattr(info, attr, None)
            if v:
                return int(v)
    except Exception:
        pass
    return 64 * 1024 * 1024


_VMEM_CAP = _tpu_vmem_capacity_bytes()
# Explicit scoped-VMEM limit: 3/4 of physical (96 MiB on v5e/v6e, 48 MiB on
# v7x and under the conservative fallback), capped at 100 MiB.
_VMEM_LIMIT = int(min(_VMEM_CAP * 3 // 4, 100 * 1024 * 1024))
# Steady state keeps 4 live activation blocks (2x double-buffered x-in +
# 2x out); budget them at half the scoped limit so the tiny stat columns and
# compiler scratch have generous headroom.
_PER_BLOCK_MAX = max(_VMEM_LIMIT // 8, 2 * 1024 * 1024)


def _largest_divisor_leq(n, cap):
    for d in range(min(n, max(1, cap)), 0, -1):
        if n % d == 0:
            return d
    return 1


def _choose_tiles(B, C, hw, itemsize, per_block_max):
    """Pick (TB, THW) for (TB, C, THW) activation blocks.

    THW is either the full hw (always a legal block) or a multiple of 128.
    TB > 1 only when a whole (C, hw) slab fits the per-block budget, in which
    case several batch samples are packed per block (TB divides B so the
    stats reduction never sees garbage padding).
    """
    row_bytes = max(1, C * itemsize)
    sample_bytes = hw * row_bytes
    if sample_bytes <= per_block_max:
        max_tb = max(1, per_block_max // sample_bytes)
        return _largest_divisor_leq(B, max_tb), hw
    if hw <= 128:
        return 1, hw
    thw = max(128, (per_block_max // row_bytes) // 128 * 128)
    return 1, min(thw, hw)


# ----------------------------------------------------------------------------
# Normalize kernel (shared by eval and train paths): one f32 FMA per element.
# ----------------------------------------------------------------------------
def bn_scale_shift_kernel(scale_ref, shift_ref, x_ref, o_ref):
    # scale/shift: (TB or 1, C, 1) f32 ;  x/o: (TB, C, THW)
    x = x_ref[...].astype(jnp.float32)      # f32 math: free filler, HBM-bound
    o_ref[...] = (x * scale_ref[...] + shift_ref[...]).astype(o_ref.dtype)


def _normalize(x3, scale, shift, *, per_sample):
    """x3: [B, C, HW]; scale/shift: [Bm, C, 1] f32 (Bm == B or 1)."""
    B, C, hw = x3.shape
    itemsize = jnp.dtype(x3.dtype).itemsize
    tb, thw = _choose_tiles(B, C, hw, itemsize, _PER_BLOCK_MAX)
    nb, nt = B // tb, pl.cdiv(hw, thw)

    if per_sample:
        stat_block = (tb, C, 1)
        stat_map = lambda b, t: (b, 0, 0)
    else:
        stat_block = (1, C, 1)
        stat_map = lambda b, t: (0, 0, 0)

    return pl.pallas_call(
        bn_scale_shift_kernel,
        out_shape=jax.ShapeDtypeStruct((B, C, hw), x3.dtype),
        grid=(nb, nt),
        in_specs=[
            pl.BlockSpec(stat_block, stat_map),
            pl.BlockSpec(stat_block, stat_map),
            pl.BlockSpec((tb, C, thw), lambda b, t: (b, 0, t)),
        ],
        out_specs=pl.BlockSpec((tb, C, thw), lambda b, t: (b, 0, t)),
        compiler_params=pltpu.CompilerParams(
            dimension_semantics=("parallel", "parallel"),
            vmem_limit_bytes=_VMEM_LIMIT),
    )(scale, shift, x3)


def _fused_scale_shift(mean, var, weight, bias, eps):
    """Hoisted per-channel math: scale/shift columns of shape (Bm, C, 1)."""
    mean = mean.astype(jnp.float32)
    var = var.astype(jnp.float32)
    inv_std = jax.lax.rsqrt(var + jnp.float32(eps))
    scale = weight.astype(jnp.float32)[None, :] * inv_std
    shift = bias.astype(jnp.float32)[None, :] - mean * scale
    return scale[..., None], shift[..., None]


# ----------------------------------------------------------------------------
# Eval-mode forward: per-sample (per-task) running statistics.
# ----------------------------------------------------------------------------
def batchnorm_eval(x, flags, running_mean_list, running_var_list,
                   weight, bias, eps=1e-5):
    B, C, H, W = x.shape
    hw = H * W
    # Hoisted flags-mixing: tiny (B, ntasks) @ (ntasks, C) XLA matmul.
    mean_bc = (flags @ running_mean_list).astype(jnp.float32)   # (B, C)
    var_bc = (flags @ running_var_list).astype(jnp.float32)     # (B, C)
    scale, shift = _fused_scale_shift(mean_bc, var_bc, weight, bias, eps)
    out3 = _normalize(x.reshape(B, C, hw), scale, shift, per_sample=True)
    return out3.reshape(B, C, H, W)


# ----------------------------------------------------------------------------
# Train-mode forward: tiled per-channel sum / sum-of-squares reduction with
# per-batch-block partial outputs, then the shared normalize kernel.
# ----------------------------------------------------------------------------
def bn_stats_kernel(x_ref, sum_ref, sumsq_ref, *, hw, thw, needs_mask):
    # x_ref: (TB, C, THW); sum_ref/sumsq_ref: (1, C, 1) f32 per-batch-block
    t = pl.program_id(1)

    @pl.when(t == 0)
    def _():
        sum_ref[...] = jnp.zeros_like(sum_ref)
        sumsq_ref[...] = jnp.zeros_like(sumsq_ref)

    x = x_ref[...].astype(jnp.float32)          # f32 accumulation

    def accumulate(xv):
        sum_ref[...] += jnp.sum(xv, axis=(0, 2), keepdims=True)
        sumsq_ref[...] += jnp.sum(xv * xv, axis=(0, 2), keepdims=True)

    if needs_mask:
        # Only the last HW tile can be partial: gate the masked path.
        is_last = t == pl.num_programs(1) - 1

        @pl.when(is_last)
        def _():
            col = jax.lax.broadcasted_iota(jnp.int32, x.shape, 2)
            accumulate(jnp.where(t * thw + col < hw, x, 0.0))

        @pl.when(jnp.logical_not(is_last))
        def _():
            accumulate(x)
    else:
        accumulate(x)


def batchnorm_train(x, weight, bias, eps=1e-5):
    # TODO(synk): nn.BatchNorm2d also updates running_mean/running_var buffers
    # with momentum during training; that stateful side-effect is not
    # materialized here (it does not affect the forward output).
    B, C, H, W = x.shape
    hw = H * W
    x3 = x.reshape(B, C, hw)

    itemsize = jnp.dtype(x3.dtype).itemsize
    tb, thw = _choose_tiles(B, C, hw, itemsize, _PER_BLOCK_MAX)
    # Prefer >= 2 batch blocks so the "parallel" batch axis can be split
    # across the two TensorCores on v7x (no effect on single-TC v5e/v6e).
    if B >= 2 and tb >= B:
        tb = _largest_divisor_leq(B, max(1, B // 2))
    nb, nt = B // tb, pl.cdiv(hw, thw)
    needs_mask = (hw % thw) != 0

    psum, psumsq = pl.pallas_call(
        functools.partial(bn_stats_kernel, hw=hw, thw=thw,
                          needs_mask=needs_mask),
        out_shape=(jax.ShapeDtypeStruct((nb, C, 1), jnp.float32),
                   jax.ShapeDtypeStruct((nb, C, 1), jnp.float32)),
        grid=(nb, nt),
        in_specs=[pl.BlockSpec((tb, C, thw), lambda b, t: (b, 0, t))],
        out_specs=(pl.BlockSpec((1, C, 1), lambda b, t: (b, 0, 0)),
                   pl.BlockSpec((1, C, 1), lambda b, t: (b, 0, 0))),
        compiler_params=pltpu.CompilerParams(
            dimension_semantics=("parallel", "arbitrary"),
            vmem_limit_bytes=_VMEM_LIMIT),
    )(x3)

    # Tiny (nb, C) final combine in XLA.
    n = jnp.float32(B * hw)
    total = jnp.sum(psum, axis=0)[:, 0]                     # (C,)
    totalsq = jnp.sum(psumsq, axis=0)[:, 0]                 # (C,)
    mean = total / n
    # Single-pass biased variance (E[x^2] - E[x]^2), f32 accumulation; clamp
    # guards tiny negatives from cancellation (documented precision tradeoff
    # vs. a two-pass centered reduction).
    var = jnp.maximum(totalsq / n - mean * mean, 0.0)

    scale, shift = _fused_scale_shift(mean[None, :], var[None, :],
                                      weight, bias, eps)
    out3 = _normalize(x3, scale, shift, per_sample=False)
    return out3.reshape(B, C, H, W)


# ----------------------------------------------------------------------------
# Pure-JAX references for verification.
# ----------------------------------------------------------------------------
def ref_eval(x, flags, rmean_list, rvar_list, weight, bias, eps=1e-5):
    mean = (flags @ rmean_list)[:, :, None, None]
    var = (flags @ rvar_list)[:, :, None, None]
    x_hat = (x - mean) / jnp.sqrt(var + eps)
    return weight[None, :, None, None] * x_hat + bias[None, :, None, None]


def ref_train(x, weight, bias, eps=1e-5):
    mean = jnp.mean(x, axis=(0, 2, 3), keepdims=True)
    var = jnp.mean((x - mean) ** 2, axis=(0, 2, 3), keepdims=True)
    x_hat = (x - mean) / jnp.sqrt(var + eps)
    return weight[None, :, None, None] * x_hat + bias[None, :, None, None]


if __name__ == "__main__":
    B, C, H, W = 2, 8, 16, 16
    ntasks = 4
    eps = 1e-5

    key = jax.random.PRNGKey(0)
    k_x, k_m, k_v, k_w, k_b = jax.random.split(key, 5)

    x = jax.random.normal(k_x, (B, C, H, W), dtype=jnp.float32)
    # flags: one-hot task selector per sample (how the module uses it in eval).
    flags = jax.nn.one_hot(jnp.array([1, 3]), ntasks, dtype=jnp.float32)

    # Buffers/params from __init__: running stats [ntasks, C], affine [C].
    running_mean_list = 0.1 * jax.random.normal(k_m, (ntasks, C), jnp.float32)
    running_var_list = 1.0 + 0.5 * jax.random.uniform(k_v, (ntasks, C),
                                                      jnp.float32)
    weight = 1.0 + 0.1 * jax.random.normal(k_w, (C,), jnp.float32)
    bias = 0.1 * jax.random.normal(k_b, (C,), jnp.float32)

    # Eval-mode path (self.training == False): the module's special path.
    out_eval = jax.block_until_ready(
        batchnorm_eval(x, flags, running_mean_list, running_var_list,
                       weight, bias, eps))
    np.testing.assert_allclose(
        np.asarray(out_eval),
        np.asarray(ref_eval(x, flags, running_mean_list, running_var_list,
                            weight, bias, eps)),
        rtol=1e-5, atol=1e-5)

    # Train-mode path (self.training == True): plain BatchNorm2d forward.
    out_train = jax.block_until_ready(batchnorm_train(x, weight, bias, eps))
    np.testing.assert_allclose(
        np.asarray(out_train),
        np.asarray(ref_train(x, weight, bias, eps)),
        rtol=1e-4, atol=1e-4)

    assert out_eval.shape == (B, C, H, W) and out_train.shape == (B, C, H, W)
    print("KERNEL_OK")
</pallas_src>

<mosaic_0001>
module attributes {stable_mosaic.version = 11 : i64} {
  func.func @bn_scale_shift_kernel(%arg0: i32, %arg1: i32, %arg2: memref<2x8x1xf32, #tpu.memory_space<vmem>>, %arg3: memref<2x8x1xf32, #tpu.memory_space<vmem>>, %arg4: memref<2x8x256xf32, #tpu.memory_space<vmem>>, %arg5: memref<2x8x256xf32, #tpu.memory_space<vmem>>) attributes {dimension_semantics = [#tpu.dimension_semantics<parallel>, #tpu.dimension_semantics<parallel>], iteration_bounds = array<i64: 1, 1>, scalar_prefetch = 0 : i64, scratch_operands = 0 : i64, tpu.core_type = #tpu.core_type<tc>, window_params = [{transform_indices = @transform_0, window_bounds = array<i64: 2, 8, 1>}, {transform_indices = @transform_1, window_bounds = array<i64: 2, 8, 1>}, {transform_indices = @transform_2, window_bounds = array<i64: 2, 8, 256>}, {transform_indices = @transform_3, window_bounds = array<i64: 2, 8, 256>}]} {
    %c0 = arith.constant 0 : index
    %c0_0 = arith.constant 0 : index
    %c0_1 = arith.constant 0 : index
    %0 = vector.load %arg4[%c0, %c0_0, %c0_1] : memref<2x8x256xf32, #tpu.memory_space<vmem>>, vector<2x8x256xf32>
    %c0_2 = arith.constant 0 : index
    %c0_3 = arith.constant 0 : index
    %c0_4 = arith.constant 0 : index
    %1 = vector.load %arg2[%c0_2, %c0_3, %c0_4] : memref<2x8x1xf32, #tpu.memory_space<vmem>>, vector<2x8x1xf32>
    %2 = vector.broadcast %1 : vector<2x8x1xf32> to vector<2x8x256xf32>
    %3 = arith.mulf %0, %2 : vector<2x8x256xf32>
    %c0_5 = arith.constant 0 : index
    %c0_6 = arith.constant 0 : index
    %c0_7 = arith.constant 0 : index
    %4 = vector.load %arg3[%c0_5, %c0_6, %c0_7] : memref<2x8x1xf32, #tpu.memory_space<vmem>>, vector<2x8x1xf32>
    %5 = vector.broadcast %4 : vector<2x8x1xf32> to vector<2x8x256xf32>
    %6 = arith.addf %3, %5 : vector<2x8x256xf32>
    %c0_8 = arith.constant 0 : index
    %c0_9 = arith.constant 0 : index
    %c0_10 = arith.constant 0 : index
    %7 = vector.load %arg5[%c0_8, %c0_9, %c0_10] : memref<2x8x256xf32, #tpu.memory_space<vmem>>, vector<2x8x256xf32>
    tpu.vector_store %arg5[%c0_8, %c0_9, %c0_10], %6 {strides = array<i32>} : memref<2x8x256xf32, #tpu.memory_space<vmem>>, vector<2x8x256xf32>,
    return
  }
  func.func @transform_0(%arg0: i32, %arg1: i32) -> (i32, i32, i32) {
    %c0_i32 = arith.constant 0 : i32
    %c0_i32_0 = arith.constant 0 : i32
    %c0_i32_1 = arith.constant 0 : i32
    return %arg0, %c0_i32, %c0_i32_0 : i32, i32, i32
  }
  func.func @transform_1(%arg0: i32, %arg1: i32) -> (i32, i32, i32) {
    %c0_i32 = arith.constant 0 : i32
    %c0_i32_0 = arith.constant 0 : i32
    %c0_i32_1 = arith.constant 0 : i32
    return %arg0, %c0_i32, %c0_i32_0 : i32, i32, i32
  }
  func.func @transform_2(%arg0: i32, %arg1: i32) -> (i32, i32, i32) {
    %c0_i32 = arith.constant 0 : i32
    %c0_i32_0 = arith.constant 0 : i32
    return %arg0, %c0_i32, %arg1 : i32, i32, i32
  }
  func.func @transform_3(%arg0: i32, %arg1: i32) -> (i32, i32, i32) {
    %c0_i32 = arith.constant 0 : i32
    %c0_i32_0 = arith.constant 0 : i32
    return %arg0, %c0_i32, %arg1 : i32, i32, i32
  }
}

</mosaic_0001>

<bundles_post_ra>
// kernel: tpu_custom_call.1
= control target key start
LH: loop header
LB: loop body
LE: loop exit
PB: predicated region body
PF: predicated region fallthrough
CT: control target
= control target key end

     0   :  { %v105_v2 = vmov 0   ;;  %s156_s0 = inlined_call_operand.vmem [shape: f32[2,8,1], index: 0, kind: input, shape index: {}]   ;;  %s157_s1 = inlined_call_operand.vmem [shape: f32[2,8,1], index: 1, kind: input, shape index: {}]   ;;  %s158_s2 = inlined_call_operand.vmem [shape: f32[2,8,256], index: 2, kind: input, shape index: {}]   ;;  %s159_s3 = inlined_call_operand.hbm [shape: f32[2,8,256], index: 3, kind: output, shape index: {}]  }
   0x1   :  { %v35_v0 = vld [vmem:[%s157_s1] sm:$0xff]  ;;  %78 = vset.pattern.permute.xlu1 %v105_v2  ;;  %77 = vset.pattern.permute.xlu0 %v105_v2 }
   0x2   :  { %v19_v1 = vld [vmem:[%s156_s0] sm:$0xff] }
   0x3   :  { %8 = vsyncpa [#allocation3], 0  ;;  %39 = vperm.xlu1 %78, %v35_v0   ;;  %23 = vperm.xlu0 %77, %v19_v1   ;;  %v36_v3 = vld [vmem:[%s157_s1 + $0x8] sm:$0xff]  ;;  %v15_v5 = vld [vmem:[%s158_s2] sm:$0xff]  ;;  %s106_s26 = smov [#allocation2]   ;;  %s61_s30 = sshll.u32 %s159_s3, 4  ;;  %s62_s30 = int_to_ptr.hbm [resolvable:$true] %s61_s30 }
   0x4   :  { %v20_v4 = vld [vmem:[%s156_s0 + $0x8] sm:$0xff]  ;;  %v17_v13 = vld [vmem:[%s158_s2 + $0x10] sm:$0xff]  ;;  %v18_v14 = vld [vmem:[%s158_s2 + $0x18] sm:$0xff]  ;;  %s59_s27 = sshll.u32 %s106_s26, 4  ;;  %s107_s4 = smov 256   ;;  %s60_s27 = int_to_ptr.vmem [resolvable:$true] %s59_s27 }
   0x5   :  { %v16_v6 = vld [vmem:[%s158_s2 + $0x8] sm:$0xff]  ;;  %s108_s5 = smov 16  }
   0xb   :  { %44 = vperm.xlu1 %78, %v36_v3   ;;  %28 = vperm.xlu0 %77, %v20_v4  }
  0x75   :  { %v40_v7 = vpop.permute.xlu1 %39  ;;  %v24_v8 = vpop.permute.xlu0 %23 }
  0x76   :  { %v31_v9 = vmul.f32 %v24_v8, %v15_v5  ;;  %v32_v10 = vmul.f32 %v24_v8, %v16_v6 }
  0x78   :  { %v47_v11 = vadd.f32 %v40_v7, %v31_v9  ;;  %v48_v12 = vadd.f32 %v40_v7, %v32_v10 }
  0x7a   :  { %51 = vst [vmem:[#allocation2] sm:$0xff] %v47_v11 }
  0x7b   :  { %52 = vst [vmem:[#allocation2 + $0x8] sm:$0xff] %v48_v12 }
  0x7d   :  { %v29_v15 = vpop.permute.xlu0 %28  ;;  %v45_v18 = vpop.permute.xlu1 %44 }
  0x7e   :  { %v33_v16 = vmul.f32 %v29_v15, %v17_v13  ;;  %v34_v17 = vmul.f32 %v29_v15, %v18_v14 }
  0x80   :  { %v49_v19 = vadd.f32 %v45_v18, %v33_v16  ;;  %v50_v20 = vadd.f32 %v45_v18, %v34_v17 }
  0x82   :  { %53 = vst [vmem:[#allocation2 + $0x10] sm:$0xff] %v49_v19 }
  0x83   :  { %54 = vst [vmem:[#allocation2 + $0x18] sm:$0xff] %v50_v20 }
  0x84   :  { %67 = dma.vmem_to_hbm [thread:$0]  %s60_s27, 512, %s62_s30, [#allocation3], %s107_s4, %s107_s4, %s108_s5  }
  0x85   :  { %103 = dma.done.wait [#allocation3], 512  }
  0x86   :  { %104 = vsyncadd [#allocation3], 4294966784 }
  0x87   :  { %72 = vsyncpa [#allocation3], 1 }

</bundles_post_ra>
